<compile_context>
chip_gen: v5e
topology: v5e:2x2
jax: 0.10.0
libtpu: 0.0.40
codegen_flags: <defaults>
</compile_context>

<pallas_src>
import functools

import jax
import jax.numpy as jnp
from jax.experimental import pallas as pl
from jax.experimental.pallas import tpu as pltpu

_SUBLANE = 8            # f32 sublane granularity
_SMALL_BATCH = 1024     # below this, plain XLA fusion beats kernel dispatch overhead


def _round_up(x, m):
    return ((x + m - 1) // m) * m


def _mlp_kernel(x_ref, w1_ref, b1_ref, w2_ref, b2_ref, w3_ref, b3_ref, o_ref):
    """One batch tile: (TM, 24) -> fc1/ReLU -> fc2/ReLU -> fc3 -> (TM, 12)."""
    x = x_ref[...]                                                        # (TM, 24)
    # MXU matmuls accumulate in f32; bias add / ReLU stay in f32 on the VPU.
    h1 = jnp.dot(x, w1_ref[...], preferred_element_type=jnp.float32) + b1_ref[...]
    h1 = jnp.maximum(h1, 0.0)                                             # (TM, 128) f32
    h1 = h1.astype(w2_ref.dtype)                                          # no-op in f32 mode
    h2 = jnp.dot(h1, w2_ref[...], preferred_element_type=jnp.float32) + b2_ref[...]
    h2 = jnp.maximum(h2, 0.0)                                             # (TM, 128) f32
    h2 = h2.astype(w3_ref.dtype)
    out = jnp.dot(h2, w3_ref[...], preferred_element_type=jnp.float32) + b3_ref[...]
    o_ref[...] = out.astype(o_ref.dtype)                                  # (TM, 12)


def _reference(x_flat, params):
    w1, b1, w2, b2, w3, b3 = params
    h = jnp.maximum(x_flat @ w1 + b1, 0.0)
    h = jnp.maximum(h @ w2 + b2, 0.0)
    return h @ w3 + b3


@functools.partial(jax.jit, static_argnames=("tile_m", "force_pallas", "use_bf16"))
def ann_forward(x, params, *, tile_m=4096, force_pallas=False, use_bf16=False):
    """x: (B, 4, 6) float32. Returns (B, 2, 6) float32."""
    w1, b1, w2, b2, w3, b3 = params
    B = x.shape[0]
    x_flat = x.reshape(B, -1).astype(jnp.float32)                         # (B, 24)
    in_dim = x_flat.shape[1]
    hidden = w1.shape[1]
    out_dim = w3.shape[1]                                                 # 12

    # Small-batch fast path: a couple of tiny matmuls is pure XLA territory.
    if B < _SMALL_BATCH and not force_pallas:
        return _reference(x_flat, params).reshape(B, 2, 6)

    # --- Batch tiling: tile multiple of 8; keep >= 2 grid steps when possible
    #     so both v7x TensorCores receive work (no-op on v5e/v6e).
    b_min = _round_up(B, _SUBLANE)
    tm = min(tile_m, b_min)
    if b_min >= 2 * _SUBLANE and tm > b_min // 2:
        tm = b_min // 2
    tm = _round_up(tm, _SUBLANE)
    grid_m = pl.cdiv(B, tm)
    b_pad = grid_m * tm
    if b_pad != B:
        x_flat = jnp.pad(x_flat, ((0, b_pad - B), (0, 0)))

    # Optional bf16 MXU operands (accumulation stays f32 inside the kernel).
    mxu_dtype = jnp.bfloat16 if use_bf16 else jnp.float32
    x_in = x_flat.astype(mxu_dtype)
    w1_in = w1.astype(mxu_dtype)
    w2_in = w2.astype(mxu_dtype)
    w3_in = w3.astype(mxu_dtype)

    def resident(arr):
        # Whole-array block with a constant index_map -> stays in VMEM, one DMA.
        return pl.BlockSpec(arr.shape, lambda i: (0, 0))

    elem = 2 if use_bf16 else 4
    param_bytes = (elem * (w1.size + w2.size + w3.size)
                   + 4 * (b1.size + b2.size + b3.size))
    cost = pl.CostEstimate(
        flops=2 * b_pad * (in_dim * hidden + hidden * hidden + hidden * out_dim),
        bytes_accessed=elem * b_pad * in_dim + 4 * b_pad * out_dim + param_bytes,
        transcendentals=0,
    )

    out_flat = pl.pallas_call(
        _mlp_kernel,
        out_shape=jax.ShapeDtypeStruct((b_pad, out_dim), jnp.float32),
        grid=(grid_m,),
        in_specs=[
            pl.BlockSpec((tm, in_dim), lambda i: (i, 0)),                 # x tile
            resident(w1_in), resident(b1),
            resident(w2_in), resident(b2),
            resident(w3_in), resident(b3),
        ],
        out_specs=pl.BlockSpec((tm, out_dim), lambda i: (i, 0)),          # (tm, 12)
        compiler_params=pltpu.CompilerParams(
            dimension_semantics=("parallel",),       # batch axis: megacore-shardable
            vmem_limit_bytes=32 * 1024 * 1024,       # safe on v7x (64 MiB VMEM) too
        ),
        cost_estimate=cost,
    )(x_in, w1_in, b1, w2_in, b2, w3_in, b3)

    # (B, 12) is already the final memory layout for (B, 2, 6) -> reshape is free.
    return out_flat[:B].reshape(B, 2, 6)


def init_params(key, input_dim=6, hidden_dim=128, output_dim=12):
    """Deterministic synthetic parameter init (matches nn.Linear shapes)."""
    in_features = input_dim * 4
    k1, k2, k3, k4, k5, k6 = jax.random.split(key, 6)
    # Stored as (in, out); biases as (1, out) for clean 2-D broadcasting in-kernel.
    w1 = jax.random.normal(k1, (in_features, hidden_dim), jnp.float32) * 0.05
    b1 = jax.random.normal(k2, (1, hidden_dim), jnp.float32) * 0.01
    w2 = jax.random.normal(k3, (hidden_dim, hidden_dim), jnp.float32) * 0.05
    b2 = jax.random.normal(k4, (1, hidden_dim), jnp.float32) * 0.01
    w3 = jax.random.normal(k5, (hidden_dim, output_dim), jnp.float32) * 0.05
    b3 = jax.random.normal(k6, (1, output_dim), jnp.float32) * 0.01
    return (w1, b1, w2, b2, w3, b3)


if __name__ == "__main__":
    key = jax.random.PRNGKey(0)
    pkey, xkey, xkey2 = jax.random.split(key, 3)

    params = init_params(pkey)                     # input_dim=6, hidden=128, output=12

    # --- Case 1: tiny batch (B=2), force the Pallas path so the kernel executes.
    B = 2
    x = jax.random.normal(xkey, (B, 4, 6), jnp.float32)   # 4 time steps, 6 features
    out = ann_forward(x, params, force_pallas=True)
    out = jax.block_until_ready(out)
    ref = _reference(x.reshape(B, -1), params).reshape(B, 2, 6)
    assert out.shape == (B, 2, 6)
    assert jnp.allclose(out, ref, atol=1e-5, rtol=1e-5)

    # --- Case 2: multi-tile grid with a ragged tail (B=300, tile=128 -> 3 steps).
    B2 = 300
    x2 = jax.random.normal(xkey2, (B2, 4, 6), jnp.float32)
    out2 = ann_forward(x2, params, tile_m=128, force_pallas=True)
    out2 = jax.block_until_ready(out2)
    ref2 = _reference(x2.reshape(B2, -1), params).reshape(B2, 2, 6)
    assert out2.shape == (B2, 2, 6)
    assert jnp.allclose(out2, ref2, atol=1e-5, rtol=1e-5)

    # --- Case 3: bf16-MXU path (optional fast mode) -> looser tolerance.
    out3 = ann_forward(x2, params, tile_m=128, force_pallas=True, use_bf16=True)
    out3 = jax.block_until_ready(out3)
    assert out3.shape == (B2, 2, 6)
    assert jnp.allclose(out3, ref2, atol=5e-2, rtol=5e-2)

    print("KERNEL_OK")
</pallas_src>

<mosaic_0001>
module attributes {stable_mosaic.version = 11 : i64} {
  func.func @_mlp_kernel(%arg0: i32, %arg1: memref<8x24xf32, #tpu.memory_space<vmem>>, %arg2: memref<24x128xf32, #tpu.memory_space<vmem>>, %arg3: memref<1x128xf32, #tpu.memory_space<vmem>>, %arg4: memref<128x128xf32, #tpu.memory_space<vmem>>, %arg5: memref<1x128xf32, #tpu.memory_space<vmem>>, %arg6: memref<128x12xf32, #tpu.memory_space<vmem>>, %arg7: memref<1x12xf32, #tpu.memory_space<vmem>>, %arg8: memref<8x12xf32, #tpu.memory_space<vmem>>) attributes {dimension_semantics = [#tpu.dimension_semantics<parallel>], iteration_bounds = array<i64: 1>, scalar_prefetch = 0 : i64, scratch_operands = 0 : i64, tpu.core_type = #tpu.core_type<tc>, window_params = [{transform_indices = @transform_0, window_bounds = array<i64: 8, 24>}, {pipeline_mode = #tpu.pipeline_mode<synchronous>, transform_indices = @transform_1, window_bounds = array<i64: 24, 128>}, {pipeline_mode = #tpu.pipeline_mode<synchronous>, transform_indices = @transform_2, window_bounds = array<i64: 1, 128>}, {pipeline_mode = #tpu.pipeline_mode<synchronous>, transform_indices = @transform_3, window_bounds = array<i64: 128, 128>}, {pipeline_mode = #tpu.pipeline_mode<synchronous>, transform_indices = @transform_4, window_bounds = array<i64: 1, 128>}, {pipeline_mode = #tpu.pipeline_mode<synchronous>, transform_indices = @transform_5, window_bounds = array<i64: 128, 12>}, {pipeline_mode = #tpu.pipeline_mode<synchronous>, transform_indices = @transform_6, window_bounds = array<i64: 1, 12>}, {transform_indices = @transform_7, window_bounds = array<i64: 8, 12>}]} {
    %c0 = arith.constant 0 : index
    %c0_0 = arith.constant 0 : index
    %0 = vector.load %arg1[%c0, %c0_0] : memref<8x24xf32, #tpu.memory_space<vmem>>, vector<8x24xf32>
    %c0_1 = arith.constant 0 : index
    %c0_2 = arith.constant 0 : index
    %1 = vector.load %arg2[%c0_1, %c0_2] : memref<24x128xf32, #tpu.memory_space<vmem>>, vector<24x128xf32>
    %cst = arith.constant dense<0.000000e+00> : vector<8x128xf32>
    %2 = tpu.matmul %0, %1, %cst {dimension_numbers = #tpu.dot_dimension_numbers<[1], [0], [0], [1], [0, 0, 1, 1], [], []>} : vector<8x24xf32>, vector<24x128xf32>, vector<8x128xf32> -> vector<8x128xf32>
    %c0_3 = arith.constant 0 : index
    %c0_4 = arith.constant 0 : index
    %3 = vector.load %arg3[%c0_3, %c0_4] : memref<1x128xf32, #tpu.memory_space<vmem>>, vector<1x128xf32>
    %4 = vector.broadcast %3 : vector<1x128xf32> to vector<8x128xf32>
    %5 = arith.addf %2, %4 : vector<8x128xf32>
    %cst_5 = arith.constant 0.000000e+00 : f32
    %6 = vector.broadcast %cst_5 : f32 to vector<8x128xf32>
    %7 = arith.maximumf %5, %6 : vector<8x128xf32>
    %c0_6 = arith.constant 0 : index
    %c0_7 = arith.constant 0 : index
    %8 = vector.load %arg4[%c0_6, %c0_7] : memref<128x128xf32, #tpu.memory_space<vmem>>, vector<128x128xf32>
    %cst_8 = arith.constant dense<0.000000e+00> : vector<8x128xf32>
    %9 = tpu.matmul %7, %8, %cst_8 {dimension_numbers = #tpu.dot_dimension_numbers<[1], [0], [0], [1], [0, 0, 1, 1], [], []>} : vector<8x128xf32>, vector<128x128xf32>, vector<8x128xf32> -> vector<8x128xf32>
    %c0_9 = arith.constant 0 : index
    %c0_10 = arith.constant 0 : index
    %10 = vector.load %arg5[%c0_9, %c0_10] : memref<1x128xf32, #tpu.memory_space<vmem>>, vector<1x128xf32>
    %11 = vector.broadcast %10 : vector<1x128xf32> to vector<8x128xf32>
    %12 = arith.addf %9, %11 : vector<8x128xf32>
    %cst_11 = arith.constant 0.000000e+00 : f32
    %13 = vector.broadcast %cst_11 : f32 to vector<8x128xf32>
    %14 = arith.maximumf %12, %13 : vector<8x128xf32>
    %c0_12 = arith.constant 0 : index
    %c0_13 = arith.constant 0 : index
    %15 = vector.load %arg6[%c0_12, %c0_13] : memref<128x12xf32, #tpu.memory_space<vmem>>, vector<128x12xf32>
    %cst_14 = arith.constant dense<0.000000e+00> : vector<8x12xf32>
    %16 = tpu.matmul %14, %15, %cst_14 {dimension_numbers = #tpu.dot_dimension_numbers<[1], [0], [0], [1], [0, 0, 1, 1], [], []>} : vector<8x128xf32>, vector<128x12xf32>, vector<8x12xf32> -> vector<8x12xf32>
    %c0_15 = arith.constant 0 : index
    %c0_16 = arith.constant 0 : index
    %17 = vector.load %arg7[%c0_15, %c0_16] : memref<1x12xf32, #tpu.memory_space<vmem>>, vector<1x12xf32>
    %18 = vector.broadcast %17 : vector<1x12xf32> to vector<8x12xf32>
    %19 = arith.addf %16, %18 : vector<8x12xf32>
    %c0_17 = arith.constant 0 : index
    %c0_18 = arith.constant 0 : index
    %20 = vector.load %arg8[%c0_17, %c0_18] : memref<8x12xf32, #tpu.memory_space<vmem>>, vector<8x12xf32>
    tpu.vector_store %arg8[%c0_17, %c0_18], %19 {strides = array<i32>} : memref<8x12xf32, #tpu.memory_space<vmem>>, vector<8x12xf32>,
    return
  }
  func.func @transform_0(%arg0: i32) -> (i32, i32) {
    %c0_i32 = arith.constant 0 : i32
    %c0_i32_0 = arith.constant 0 : i32
    return %arg0, %c0_i32 : i32, i32
  }
  func.func @transform_1(%arg0: i32) -> (i32, i32) {
    %c0_i32 = arith.constant 0 : i32
    %c0_i32_0 = arith.constant 0 : i32
    %c0_i32_1 = arith.constant 0 : i32
    return %c0_i32, %c0_i32_0 : i32, i32
  }
  func.func @transform_2(%arg0: i32) -> (i32, i32) {
    %c0_i32 = arith.constant 0 : i32
    %c0_i32_0 = arith.constant 0 : i32
    %c0_i32_1 = arith.constant 0 : i32
    return %c0_i32, %c0_i32_0 : i32, i32
  }
  func.func @transform_3(%arg0: i32) -> (i32, i32) {
    %c0_i32 = arith.constant 0 : i32
    %c0_i32_0 = arith.constant 0 : i32
    %c0_i32_1 = arith.constant 0 : i32
    return %c0_i32, %c0_i32_0 : i32, i32
  }
  func.func @transform_4(%arg0: i32) -> (i32, i32) {
    %c0_i32 = arith.constant 0 : i32
    %c0_i32_0 = arith.constant 0 : i32
    %c0_i32_1 = arith.constant 0 : i32
    return %c0_i32, %c0_i32_0 : i32, i32
  }
  func.func @transform_5(%arg0: i32) -> (i32, i32) {
    %c0_i32 = arith.constant 0 : i32
    %c0_i32_0 = arith.constant 0 : i32
    %c0_i32_1 = arith.constant 0 : i32
    return %c0_i32, %c0_i32_0 : i32, i32
  }
  func.func @transform_6(%arg0: i32) -> (i32, i32) {
    %c0_i32 = arith.constant 0 : i32
    %c0_i32_0 = arith.constant 0 : i32
    %c0_i32_1 = arith.constant 0 : i32
    return %c0_i32, %c0_i32_0 : i32, i32
  }
  func.func @transform_7(%arg0: i32) -> (i32, i32) {
    %c0_i32 = arith.constant 0 : i32
    %c0_i32_0 = arith.constant 0 : i32
    return %arg0, %c0_i32 : i32, i32
  }
}

</mosaic_0001>

<bundles_post_ra>
// kernel: ann_forward.1
= control target key start
LH: loop header
LB: loop body
LE: loop exit
PB: predicated region body
PF: predicated region fallthrough
CT: control target
= control target key end

     0   :  { %12 = vsyncpa [#allocation3], 0  ;;  %s192_s27 = smov [#allocation2]   ;;  %s353_s0 = inlined_call_operand.vmem [shape: f32[8,24], index: 0, kind: input, shape index: {}]   ;;  %s354_s1 = inlined_call_operand.vmem [shape: f32[24,128], index: 1, kind: input, shape index: {}]   ;;  %s355_s2 = inlined_call_operand.vmem [shape: f32[1,128], index: 2, kind: input, shape index: {}]   ;;  %s356_s3 = inlined_call_operand.vmem [shape: f32[128,128], index: 3, kind: input, shape index: {}]   ;;  %s357_s4 = inlined_call_operand.hbm [shape: f32[1,128], index: 4, kind: input, shape index: {}]   ;;  %s358_s5 = inlined_call_operand.vmem [shape: f32[128,12], index: 5, kind: input, shape index: {}]   ;;  %s359_s6 = inlined_call_operand.vmem [shape: f32[1,12], index: 6, kind: input, shape index: {}]   ;;  %s360_s7 = inlined_call_operand.vmem [shape: f32[8,12], index: 7, kind: output, shape index: {}]  }
   0x1   :  { %s26_s26 = sshll.u32 %s357_s4, 4  ;;  %s28_s28 = sshll.u32 %s192_s27, 4  ;;  %s27_s26 = int_to_ptr.hbm [resolvable:$true] %s26_s26  ;;  %s29_s28 = int_to_ptr.vmem [resolvable:$true] %s28_s28 }
   0x2   :  { %31 = dma.hbm_to_vmem [thread:$0]  %s27_s26, 16, %s29_s28, [#allocation3]  }
   0x3   :  { %190 = dma.done.wait [#allocation3], 16  }
   0x4   :  { %191 = vsyncadd [#allocation3], 4294967280  ;;  %v43_v0 = vld [vmem:[%s354_s1 + $0x10] sm:$0xff]  ;;  %v42_v1 = vld [vmem:[%s354_s1 + $0x8] sm:$0xff]  ;;  %vm48_vm0 = vcmask 195584   ;;  %vm154_vm1 = vcmask 97280  }
   0x5   :  { %65 = vmatpush.msra.mxu0 %v43_v0  ;;  %v88_v2 = vld [vmem:[%s356_s3 + $0x78] sm:$0xff]  ;;  %v87_v3 = vld [vmem:[%s356_s3 + $0x70] sm:$0xff]  ;;  %v41_v4 = vld [vmem:[%s354_s1] sm:$0xff] }
   0x6   :  { %93 = vmatpush.msra.mxu1 %v88_v2  ;;  %v40_v5 = vld [vmem:[%s353_s0] sm:$0xff]  ;;  %v86_v6 = vld [vmem:[%s356_s3 + $0x68] sm:$0xff]  ;;  %v84_v8 = vld [vmem:[%s356_s3 + $0x58] sm:$0xff] }
   0x7   :  { %66 = vmatpush.msra.mxu0 %v42_v1  ;;  %v85_v7 = vld [vmem:[%s356_s3 + $0x60] sm:$0xff]  ;;  %v83_v9 = vld [vmem:[%s356_s3 + $0x50] sm:$0xff]  ;;  %v82_v10 = vld [vmem:[%s356_s3 + $0x48] sm:$0xff] }
   0x8   :  { %94 = vmatpush.msra.mxu1 %v87_v3  ;;  %v81_v11 = vld [vmem:[%s356_s3 + $0x40] sm:$0xff]  ;;  %v80_v12 = vld [vmem:[%s356_s3 + $0x38] sm:$0xff]  ;;  %v79_v13 = vld [vmem:[%s356_s3 + $0x30] sm:$0xff] }
   0x9   :  { %67 = vmatpush.msra.mxu0 %v41_v4  ;;  %v78_v14 = vld [vmem:[%s356_s3 + $0x28] sm:$0xff]  ;;  %v77_v15 = vld [vmem:[%s356_s3 + $0x20] sm:$0xff]  ;;  %v76_v16 = vld [vmem:[%s356_s3 + $0x18] sm:$0xff] }
   0xa   :  { %161 = vmatmul.msk.f32.vlgmr.msra.gmra.mxu0 %vm48_vm0, %v40_v5  ;;  %95 = vmatpush.msra.mxu1 %v86_v6  ;;  %v75_v17 = vld [vmem:[%s356_s3 + $0x10] sm:$0xff]  ;;  %v74_v18 = vld [vmem:[%s356_s3 + $0x8] sm:$0xff]  ;;  %v73_v19 = vld [vmem:[%s356_s3] sm:$0xff] }
   0xb   :  { %v129_v20 = vld [vmem:[%s358_s5 + $0x78] sm:$0xff]  ;;  %v128_v21 = vld [vmem:[%s358_s5 + $0x70] sm:$0xff]  ;;  %v127_v22 = vld [vmem:[%s358_s5 + $0x68] sm:$0xff] }
   0xc   :  { %96 = vmatpush.msra.mxu1 %v85_v7  ;;  %134 = vmatpush.msra.mxu2 %v129_v20  ;;  %v126_v23 = vld [vmem:[%s358_s5 + $0x60] sm:$0xff]  ;;  %v125_v24 = vld [vmem:[%s358_s5 + $0x58] sm:$0xff]  ;;  %v124_v25 = vld [vmem:[%s358_s5 + $0x50] sm:$0xff] }
   0xd   :  { %v123_v26 = vld [vmem:[%s358_s5 + $0x48] sm:$0xff]  ;;  %v122_v27 = vld [vmem:[%s358_s5 + $0x40] sm:$0xff]  ;;  %v121_v28 = vld [vmem:[%s358_s5 + $0x38] sm:$0xff] }
   0xe   :  { %97 = vmatpush.msra.mxu1 %v84_v8  ;;  %135 = vmatpush.msra.mxu2 %v128_v21  ;;  %v120_v29 = vld [vmem:[%s358_s5 + $0x30] sm:$0xff]  ;;  %v119_v30 = vld [vmem:[%s358_s5 + $0x28] sm:$0xff]  ;;  %v118_v31 = vld [vmem:[%s358_s5 + $0x20] sm:$0xff] }
   0xf   :  { %v117_v32 = vld [vmem:[%s358_s5 + $0x18] sm:$0xff]  ;;  %v163_v33 = vld [vmem:[%s355_s2] ss:$0 sm:$0xff]  ;;  %v116_v37 = vld [vmem:[%s358_s5 + $0x10] sm:$0xff] }
  0x10   :  { %98 = vmatpush.msra.mxu1 %v83_v9  ;;  %136 = vmatpush.msra.mxu2 %v127_v22  ;;  %v115_v38 = vld [vmem:[%s358_s5 + $0x8] sm:$0xff]  ;;  %v114_v39 = vld [vmem:[%s358_s5] sm:$0xff]  ;;  %v164_v40 = vld [vmem:[#allocation2] ss:$0 sm:$0xff] }
  0x11   :  { %v165_v44 = vld [vmem:[%s359_s6] ss:$0 sm:$0xff] }
  0x12   :  { %99 = vmatpush.msra.mxu1 %v82_v10  ;;  %137 = vmatpush.msra.mxu2 %v126_v23 }
  0x14   :  { %100 = vmatpush.msra.mxu1 %v81_v11  ;;  %138 = vmatpush.msra.mxu2 %v125_v24 }
  0x16   :  { %101 = vmatpush.msra.mxu1 %v80_v12  ;;  %139 = vmatpush.msra.mxu2 %v124_v25 }
  0x18   :  { %102 = vmatpush.msra.mxu1 %v79_v13  ;;  %140 = vmatpush.msra.mxu2 %v123_v26 }
  0x1a   :  { %103 = vmatpush.msra.mxu1 %v78_v14  ;;  %141 = vmatpush.msra.mxu2 %v122_v27 }
  0x1c   :  { %104 = vmatpush.msra.mxu1 %v77_v15  ;;  %142 = vmatpush.msra.mxu2 %v121_v28 }
  0x1e   :  { %105 = vmatpush.msra.mxu1 %v76_v16  ;;  %143 = vmatpush.msra.mxu2 %v120_v29 }
  0x20   :  { %106 = vmatpush.msra.mxu1 %v75_v17  ;;  %144 = vmatpush.msra.mxu2 %v119_v30 }
  0x22   :  { %107 = vmatpush.msra.mxu1 %v74_v18  ;;  %145 = vmatpush.msra.mxu2 %v118_v31 }
  0x24   :  { %108 = vmatpush.msra.mxu1 %v73_v19  ;;  %146 = vmatpush.msra.mxu2 %v117_v32 }
  0x26   :  { %147 = vmatpush.msra.mxu2 %v116_v37 }
  0x28   :  { %148 = vmatpush.msra.mxu2 %v115_v38 }
  0x2a   :  { %149 = vmatpush.msra.mxu2 %v114_v39 }
  0x87   :  { %v69_v34 = vpop.f32.mrf.mxu0 }
  0x88   :  { %v70_v35 = vadd.f32 %v163_v33, %v69_v34 }
  0x8a   :  { %v72_v36 = vmax.f32 %v70_v35, 0.0 }
  0x8c   :  { %109 = vmatmul.f32.vlgmr.msra.gmra.mxu1 %v72_v36 }
 0x109   :  { %v110_v41 = vpop.f32.mrf.mxu1 }
 0x10a   :  { %v111_v42 = vadd.f32 %v164_v40, %v110_v41 }
 0x10c   :  { %v113_v43 = vmax.f32 %v111_v42, 0.0 }
 0x10e   :  { %150 = vmatmul.f32.vlgmr.msra.gmra.mxu2 %v113_v43 }
 0x191   :  { %v151_v45 = vpop.f32.mrf.mxu2 }
 0x192   :  { %v152_v46 = vadd.f32 %v165_v44, %v151_v45 }
 0x194   :  { %155 = vst.msk [vmem:[%s360_s7] sm:$0xff] %vm154_vm1, %v152_v46 }
 0x195   :  { %160 = vsyncpa [#allocation3], 1 }

</bundles_post_ra>
